<compile_context>
chip_gen: v7x
topology: tpu7x:2x2x1
jax: 0.10.0
libtpu: 0.0.40
codegen_flags: <defaults>
</compile_context>

<pallas_src>
import functools

import jax
import jax.numpy as jnp
from jax.experimental import pallas as pl
from jax.experimental.pallas import tpu as pltpu

HIDDEN_DIM = 128
OUT_DIM = 21  # 21 joint angles
SUBLANE = 8


def _mlp_kernel(x_ref, w1_ref, b1_ref, w2_ref, b2_ref, w3_ref, b3_ref, o_ref):
    wd = w1_ref.dtype  # MXU operand dtype (bf16 by default, f32 optional)

    # Layer 1: Linear + ReLU. x is cast to the operand dtype in-register (cheap VPU cast;
    # avoids a separate HBM pre-cast pass). Accumulation is f32 on the MXU.
    x = x_ref[...].astype(wd)
    h1 = jnp.dot(x, w1_ref[...], preferred_element_type=jnp.float32)
    h1 = jnp.maximum(h1 + b1_ref[...], 0.0)
    # TODO(synk): Dropout(0.3) is a no-op at inference; training-mode dropout would need
    # pltpu.prng_seed + pltpu.stateful_bernoulli here.

    # Layer 2: Linear + ReLU
    h2 = jnp.dot(h1.astype(wd), w2_ref[...], preferred_element_type=jnp.float32)
    h2 = jnp.maximum(h2 + b2_ref[...], 0.0)

    # Layer 3: Linear (output head, native N=21 columns)
    out = jnp.dot(h2.astype(wd), w3_ref[...], preferred_element_type=jnp.float32) + b3_ref[...]
    o_ref[...] = out.astype(o_ref.dtype)


def _round_up(n, m):
    return pl.cdiv(n, m) * m


@functools.partial(jax.jit, static_argnames=("block_batch", "compute_dtype"))
def posture_estimator_forward(x, params, block_batch=1024, compute_dtype=jnp.bfloat16):
    """Fused MLP forward. x: (B, input_dim) -> (B, 21) float32.

    block_batch: max rows per grid step (rounded down to a multiple of 8; additionally
                 capped at ~B/2 so the grid has >=2 steps for v7x's two TensorCores).
    compute_dtype: MXU operand dtype (bf16 default = fast path + half the weight DMA
                 bytes; accumulation is always f32). Note: bf16 mode quantizes the inputs
                 to bf16 for the matmuls — fine for inference, use f32 for exact math.
    """
    w1, b1, w2, b2, w3, b3 = params
    B, D = x.shape
    H = w1.shape[1]
    N = w3.shape[1]

    # Batch tiling: multiple of 8 sublanes. Cap at ~half the (8-rounded) batch so that
    # whenever the batch is big enough we get >=2 grid steps (v7x megacore sharding).
    B8 = _round_up(B, SUBLANE)
    bb = max(SUBLANE, (min(block_batch, B8) // SUBLANE) * SUBLANE)
    half = (B8 // 2 // SUBLANE) * SUBLANE
    if half >= SUBLANE:
        bb = min(bb, half)
    grid = (pl.cdiv(B, bb),)  # ragged last block handled by Pallas (masked writeback)

    # One-time weight casts (tiny, VMEM-resident for the whole grid). Biases stay f32
    # and are added on the f32 accumulator.
    w1_c = w1.astype(compute_dtype)
    w2_c = w2.astype(compute_dtype)
    w3_c = w3.astype(compute_dtype)
    b1_c = b1.astype(jnp.float32)
    b2_c = b2.astype(jnp.float32)
    b3_c = b3.astype(jnp.float32)

    const = lambda i: (0, 0)  # weights/biases: same block every step -> fetched once
    return pl.pallas_call(
        _mlp_kernel,
        out_shape=jax.ShapeDtypeStruct((B, N), jnp.float32),
        grid_spec=pltpu.PrefetchScalarGridSpec(
            num_scalar_prefetch=0,
            grid=grid,
            in_specs=[
                pl.BlockSpec((bb, D), lambda i: (i, 0)),  # x tile, native (unpadded) K
                pl.BlockSpec((D, H), const),              # w1
                pl.BlockSpec((1, H), const),              # b1
                pl.BlockSpec((H, H), const),              # w2
                pl.BlockSpec((1, H), const),              # b2
                pl.BlockSpec((H, N), const),              # w3 (native N=21)
                pl.BlockSpec((1, N), const),              # b3
            ],
            out_specs=pl.BlockSpec((bb, N), lambda i: (i, 0)),  # native (B, 21) store
        ),
        compiler_params=pltpu.CompilerParams(
            dimension_semantics=("parallel",),
        ),
    )(x, w1_c, b1_c, w2_c, b2_c, w3_c, b3_c)


def init_params(key, input_dim, hidden_dim=HIDDEN_DIM, out_dim=OUT_DIM):
    """Deterministic init mimicking nn.Linear (uniform +-1/sqrt(fan_in))."""
    keys = jax.random.split(key, 6)

    def linear(kw, kb, fan_in, fan_out):
        bound = 1.0 / jnp.sqrt(fan_in)
        w = jax.random.uniform(kw, (fan_in, fan_out), jnp.float32, -bound, bound)
        b = jax.random.uniform(kb, (1, fan_out), jnp.float32, -bound, bound)
        return w, b

    w1, b1 = linear(keys[0], keys[1], input_dim, hidden_dim)
    w2, b2 = linear(keys[2], keys[3], hidden_dim, hidden_dim)
    w3, b3 = linear(keys[4], keys[5], hidden_dim, out_dim)
    return (w1, b1, w2, b2, w3, b3)


def reference_forward(x, params):
    w1, b1, w2, b2, w3, b3 = params
    hp = "highest"
    h1 = jnp.maximum(jnp.dot(x, w1, precision=hp) + b1, 0.0)
    h2 = jnp.maximum(jnp.dot(h1, w2, precision=hp) + b2, 0.0)
    return jnp.dot(h2, w3, precision=hp) + b3


if __name__ == "__main__":
    key = jax.random.PRNGKey(0)
    k_x, k_p = jax.random.split(key)

    batch, input_dim = 8, 32
    x = jax.random.normal(k_x, (batch, input_dim), jnp.float32)
    params = init_params(k_p, input_dim)
    ref = reference_forward(x, params)

    # Default path: bf16 MXU operands, f32 accumulation.
    out = jax.block_until_ready(posture_estimator_forward(x, params))
    assert out.shape == (batch, OUT_DIM), out.shape
    assert jnp.allclose(out, ref, atol=5e-2, rtol=5e-2), float(jnp.max(jnp.abs(out - ref)))

    # f32 operand path (tolerance allows for MXU f32-via-bf16-pass lowering differences).
    out_f32 = jax.block_until_ready(
        posture_estimator_forward(x, params, compute_dtype=jnp.float32))
    assert out_f32.shape == (batch, OUT_DIM), out_f32.shape
    assert jnp.allclose(out_f32, ref, atol=2e-2, rtol=2e-2), float(
        jnp.max(jnp.abs(out_f32 - ref)))

    # Multi-step grid + ragged batch (exercises batch tiling, >=2 grid steps, and the
    # masked writeback of the partial last block).
    batch2 = 40
    x2 = jax.random.normal(jax.random.PRNGKey(1), (batch2, input_dim), jnp.float32)
    ref2 = reference_forward(x2, params)
    out2 = jax.block_until_ready(posture_estimator_forward(x2, params, block_batch=16))
    assert out2.shape == (batch2, OUT_DIM), out2.shape
    assert jnp.allclose(out2, ref2, atol=5e-2, rtol=5e-2), float(jnp.max(jnp.abs(out2 - ref2)))

    print("KERNEL_OK")
</pallas_src>

<mosaic_0001>
module attributes {stable_mosaic.version = 11 : i64} {
  func.func @_mlp_kernel(%arg0: i32, %arg1: memref<8x32xf32, #tpu.memory_space<vmem>>, %arg2: memref<32x128xbf16, #tpu.memory_space<vmem>>, %arg3: memref<1x128xf32, #tpu.memory_space<vmem>>, %arg4: memref<128x128xbf16, #tpu.memory_space<vmem>>, %arg5: memref<1x128xf32, #tpu.memory_space<vmem>>, %arg6: memref<128x21xbf16, #tpu.memory_space<vmem>>, %arg7: memref<1x21xf32, #tpu.memory_space<vmem>>, %arg8: memref<8x21xf32, #tpu.memory_space<vmem>>) attributes {dimension_semantics = [#tpu.dimension_semantics<parallel>], iteration_bounds = array<i64: 1>, scalar_prefetch = 0 : i64, scratch_operands = 0 : i64, tpu.core_type = #tpu.core_type<tc>, window_params = [{transform_indices = @transform_0, window_bounds = array<i64: 8, 32>}, {pipeline_mode = #tpu.pipeline_mode<synchronous>, transform_indices = @transform_1, window_bounds = array<i64: 32, 128>}, {pipeline_mode = #tpu.pipeline_mode<synchronous>, transform_indices = @transform_2, window_bounds = array<i64: 1, 128>}, {pipeline_mode = #tpu.pipeline_mode<synchronous>, transform_indices = @transform_3, window_bounds = array<i64: 128, 128>}, {pipeline_mode = #tpu.pipeline_mode<synchronous>, transform_indices = @transform_4, window_bounds = array<i64: 1, 128>}, {pipeline_mode = #tpu.pipeline_mode<synchronous>, transform_indices = @transform_5, window_bounds = array<i64: 128, 21>}, {pipeline_mode = #tpu.pipeline_mode<synchronous>, transform_indices = @transform_6, window_bounds = array<i64: 1, 21>}, {transform_indices = @transform_7, window_bounds = array<i64: 8, 21>}]} {
    %c0 = arith.constant 0 : index
    %c0_0 = arith.constant 0 : index
    %0 = vector.load %arg1[%c0, %c0_0] : memref<8x32xf32, #tpu.memory_space<vmem>>, vector<8x32xf32>
    %1 = arith.truncf %0 : vector<8x32xf32> to vector<8x32xbf16>
    %c0_1 = arith.constant 0 : index
    %c0_2 = arith.constant 0 : index
    %2 = vector.load %arg2[%c0_1, %c0_2] : memref<32x128xbf16, #tpu.memory_space<vmem>>, vector<32x128xbf16>
    %cst = arith.constant dense<0.000000e+00> : vector<8x128xf32>
    %3 = tpu.matmul %1, %2, %cst {dimension_numbers = #tpu.dot_dimension_numbers<[1], [0], [0], [1], [0, 0, 1, 1], [], []>} : vector<8x32xbf16>, vector<32x128xbf16>, vector<8x128xf32> -> vector<8x128xf32>
    %c0_3 = arith.constant 0 : index
    %c0_4 = arith.constant 0 : index
    %4 = vector.load %arg3[%c0_3, %c0_4] : memref<1x128xf32, #tpu.memory_space<vmem>>, vector<1x128xf32>
    %5 = vector.broadcast %4 : vector<1x128xf32> to vector<8x128xf32>
    %6 = arith.addf %3, %5 : vector<8x128xf32>
    %cst_5 = arith.constant 0.000000e+00 : f32
    %7 = vector.broadcast %cst_5 : f32 to vector<8x128xf32>
    %8 = arith.maximumf %6, %7 : vector<8x128xf32>
    %9 = arith.truncf %8 : vector<8x128xf32> to vector<8x128xbf16>
    %c0_6 = arith.constant 0 : index
    %c0_7 = arith.constant 0 : index
    %10 = vector.load %arg4[%c0_6, %c0_7] : memref<128x128xbf16, #tpu.memory_space<vmem>>, vector<128x128xbf16>
    %cst_8 = arith.constant dense<0.000000e+00> : vector<8x128xf32>
    %11 = tpu.matmul %9, %10, %cst_8 {dimension_numbers = #tpu.dot_dimension_numbers<[1], [0], [0], [1], [0, 0, 1, 1], [], []>} : vector<8x128xbf16>, vector<128x128xbf16>, vector<8x128xf32> -> vector<8x128xf32>
    %c0_9 = arith.constant 0 : index
    %c0_10 = arith.constant 0 : index
    %12 = vector.load %arg5[%c0_9, %c0_10] : memref<1x128xf32, #tpu.memory_space<vmem>>, vector<1x128xf32>
    %13 = vector.broadcast %12 : vector<1x128xf32> to vector<8x128xf32>
    %14 = arith.addf %11, %13 : vector<8x128xf32>
    %cst_11 = arith.constant 0.000000e+00 : f32
    %15 = vector.broadcast %cst_11 : f32 to vector<8x128xf32>
    %16 = arith.maximumf %14, %15 : vector<8x128xf32>
    %17 = arith.truncf %16 : vector<8x128xf32> to vector<8x128xbf16>
    %c0_12 = arith.constant 0 : index
    %c0_13 = arith.constant 0 : index
    %18 = vector.load %arg6[%c0_12, %c0_13] : memref<128x21xbf16, #tpu.memory_space<vmem>>, vector<128x21xbf16>
    %cst_14 = arith.constant dense<0.000000e+00> : vector<8x21xf32>
    %19 = tpu.matmul %17, %18, %cst_14 {dimension_numbers = #tpu.dot_dimension_numbers<[1], [0], [0], [1], [0, 0, 1, 1], [], []>} : vector<8x128xbf16>, vector<128x21xbf16>, vector<8x21xf32> -> vector<8x21xf32>
    %c0_15 = arith.constant 0 : index
    %c0_16 = arith.constant 0 : index
    %20 = vector.load %arg7[%c0_15, %c0_16] : memref<1x21xf32, #tpu.memory_space<vmem>>, vector<1x21xf32>
    %21 = vector.broadcast %20 : vector<1x21xf32> to vector<8x21xf32>
    %22 = arith.addf %19, %21 : vector<8x21xf32>
    %c0_17 = arith.constant 0 : index
    %c0_18 = arith.constant 0 : index
    %23 = vector.load %arg8[%c0_17, %c0_18] : memref<8x21xf32, #tpu.memory_space<vmem>>, vector<8x21xf32>
    tpu.vector_store %arg8[%c0_17, %c0_18], %22 {strides = array<i32>} : memref<8x21xf32, #tpu.memory_space<vmem>>, vector<8x21xf32>,
    return
  }
  func.func @transform_0(%arg0: i32) -> (i32, i32) {
    %c0_i32 = arith.constant 0 : i32
    %c0_i32_0 = arith.constant 0 : i32
    return %arg0, %c0_i32 : i32, i32
  }
  func.func @transform_1(%arg0: i32) -> (i32, i32) {
    %c0_i32 = arith.constant 0 : i32
    %c0_i32_0 = arith.constant 0 : i32
    %c0_i32_1 = arith.constant 0 : i32
    return %c0_i32, %c0_i32_0 : i32, i32
  }
  func.func @transform_2(%arg0: i32) -> (i32, i32) {
    %c0_i32 = arith.constant 0 : i32
    %c0_i32_0 = arith.constant 0 : i32
    %c0_i32_1 = arith.constant 0 : i32
    return %c0_i32, %c0_i32_0 : i32, i32
  }
  func.func @transform_3(%arg0: i32) -> (i32, i32) {
    %c0_i32 = arith.constant 0 : i32
    %c0_i32_0 = arith.constant 0 : i32
    %c0_i32_1 = arith.constant 0 : i32
    return %c0_i32, %c0_i32_0 : i32, i32
  }
  func.func @transform_4(%arg0: i32) -> (i32, i32) {
    %c0_i32 = arith.constant 0 : i32
    %c0_i32_0 = arith.constant 0 : i32
    %c0_i32_1 = arith.constant 0 : i32
    return %c0_i32, %c0_i32_0 : i32, i32
  }
  func.func @transform_5(%arg0: i32) -> (i32, i32) {
    %c0_i32 = arith.constant 0 : i32
    %c0_i32_0 = arith.constant 0 : i32
    %c0_i32_1 = arith.constant 0 : i32
    return %c0_i32, %c0_i32_0 : i32, i32
  }
  func.func @transform_6(%arg0: i32) -> (i32, i32) {
    %c0_i32 = arith.constant 0 : i32
    %c0_i32_0 = arith.constant 0 : i32
    %c0_i32_1 = arith.constant 0 : i32
    return %c0_i32, %c0_i32_0 : i32, i32
  }
  func.func @transform_7(%arg0: i32) -> (i32, i32) {
    %c0_i32 = arith.constant 0 : i32
    %c0_i32_0 = arith.constant 0 : i32
    return %arg0, %c0_i32 : i32, i32
  }
}

</mosaic_0001>

<bundles_post_ra>
// kernel: posture_estimator_forward.1
= control target key start
LH: loop header
LB: loop body
LE: loop exit
PB: predicated region body
PF: predicated region fallthrough
CT: control target
= control target key end

     0   :  { %v475_v1 = vmov 0.0   ;;  %vm476_vm0 = vmmov 0   ;;  %vm53_vm1 = vcmask 261120   ;;  %s620_s0 = inlined_call_operand.vmem [shape: f32[8,32], index: 0, kind: input, shape index: {}]   ;;  %s621_s1 = inlined_call_operand.vmem [shape: bf16[32,128], index: 1, kind: input, shape index: {}]   ;;  %s622_s2 = inlined_call_operand.vmem [shape: f32[1,128], index: 2, kind: input, shape index: {}]   ;;  %s623_s3 = inlined_call_operand.vmem [shape: bf16[128,128], index: 3, kind: input, shape index: {}]   ;;  %s624_s4 = inlined_call_operand.vmem [shape: f32[1,128], index: 4, kind: input, shape index: {}]   ;;  %s625_s5 = inlined_call_operand.vmem [shape: bf16[128,21], index: 5, kind: input, shape index: {}]   ;;  %s626_s6 = inlined_call_operand.vmem [shape: f32[1,21], index: 6, kind: input, shape index: {}]   ;;  %s627_s7 = inlined_call_operand.hbm [shape: f32[8,21], index: 7, kind: output, shape index: {}]  }
   0x1   :  { %v433_v0 = vld [vmem:[%s621_s1] sm:$0xff]   ;;  %382 = vmatprep.subr.bf16.mxu0 %v475_v1  ;;  %v434_v2 = vld [vmem:[%s621_s1 + $0x8] sm:$0xff]   ;;  %390 = vmatprep.subr.bf16.mxu1 %v475_v1  ;;  %v437_v7 = vld [vmem:[%s623_s3 + $0x10] sm:$0xff]  }
   0x2   :  { %383 = vmatpush3.bf16.msra.mxu0 %v433_v0  ;;  %386 = vmatprep.mubr.msk.bf16.mxu0 %vm476_vm0, %v475_v1  ;;  %v28_v3 = vld [vmem:[%s620_s0] sm:$0xff]  ;;  %v436_v6 = vld [vmem:[%s623_s3 + $0x8] sm:$0xff]   ;;  %v438_v8 = vld [vmem:[%s623_s3 + $0x18] sm:$0xff]  }
   0x3   :  { %384 = vmatprep.subr.bf16.mxu0 %v475_v1  ;;  %v435_v4 = vld [vmem:[%s623_s3] sm:$0xff]   ;;  %406 = vmatprep.mubr.msk.bf16.mxu1 %vm476_vm0, %v475_v1  ;;  %v29_v5 = vpack.c.bf16 %v28_v3, %v28_v3 }
   0x4   :  { %391 = vmatpush3.bf16.msra.mxu1 %v435_v4 }
   0x5   :  { %392 = vmatprep.subr.bf16.mxu1 %v475_v1 }
   0x6   :  { %385 = vmatpush3.bf16.msra.mxu0 %v434_v2 }
   0x7   :  { %410 = vmatprep.subr.bf16.mxu0 %v475_v1 }
   0x8   :  { %393 = vmatpush3.bf16.msra.mxu1 %v436_v6 }
   0x9   :  { %387 = vmatmul.mubr.msk.bf16.vlgmr.msra.gmra.mrb[0].mxu0 %vm53_vm1, %v29_v5  ;;  %394 = vmatprep.subr.bf16.mxu1 %v475_v1 }
   0xa   :  { %426 = vmatprep.mubr.msk.bf16.mxu0 %vm476_vm0, %v475_v1 }
   0xc   :  { %395 = vmatpush3.bf16.msra.mxu1 %v437_v7 }
   0xd   :  { %396 = vmatprep.subr.bf16.mxu1 %v475_v1 }
   0xe   :  { %12 = vsyncpa [#allocation3], 0  ;;  %v439_v9 = vld [vmem:[%s623_s3 + $0x20] sm:$0xff]   ;;  %v440_v10 = vld [vmem:[%s623_s3 + $0x28] sm:$0xff]   ;;  %s477_s16 = smov [#allocation2]   ;;  %vm323_vm2 = vcmask 171008  }
   0xf   :  { %v441_v11 = vld [vmem:[%s623_s3 + $0x30] sm:$0xff]   ;;  %v442_v12 = vld [vmem:[%s623_s3 + $0x38] sm:$0xff]   ;;  %v443_v13 = vld [vmem:[%s625_s5] sm:$0xff]   ;;  %s331_s17 = sshll.u32 %s477_s16, 4  ;;  %s332_s17 = int_to_ptr.vmem [resolvable:$true] %s331_s17 }
  0x10   :  { %397 = vmatpush3.bf16.msra.mxu1 %v438_v8  ;;  %411 = vmatpush3.bf16.msra.mxu0 %v443_v13  ;;  %v444_v14 = vld [vmem:[%s625_s5 + $0x8] sm:$0xff]   ;;  %v445_v15 = vld [vmem:[%s625_s5 + $0x10] sm:$0xff]   ;;  %v446_v16 = vld [vmem:[%s625_s5 + $0x18] sm:$0xff]   ;;  %p456_p1 = scmp.lt.s32.totalorder %s332_s17, %s332_s17 }
  0x11   :  { %398 = vmatprep.subr.bf16.mxu1 %v475_v1  ;;  %412 = vmatprep.subr.bf16.mxu0 %v475_v1  ;;  %v447_v17 = vld [vmem:[%s625_s5 + $0x20] sm:$0xff]   ;;  %v448_v18 = vld [vmem:[%s625_s5 + $0x28] sm:$0xff]   ;;  %v449_v27 = vld [vmem:[%s625_s5 + $0x30] sm:$0xff]  }
  0x12   :  { %v339_v19 = vld [vmem:[%s622_s2] ss:$0 sm:$0xff]  ;;  %v450_v28 = vld [vmem:[%s625_s5 + $0x38] sm:$0xff]  }
  0x13   :  { %v343_v29 = vld [vmem:[%s624_s4] ss:$0 sm:$0xff]  ;;  %s451_s4 = scalar_lea.vmem %s332_s17, 128 }
  0x14   :  { %399 = vmatpush3.bf16.msra.mxu1 %v439_v9  ;;  %413 = vmatpush3.bf16.msra.mxu0 %v444_v14  ;;  %v352_v37 = vld [vmem:[%s626_s6] ss:$0 sm:$0xff]  ;;  %p452_p0 = scmp.ne.s32.totalorder %s332_s17, %s451_s4  ;;  %p457_p2 = scmp.lt.s32.totalorder %s451_s4, %s451_s4 }
  0x15   :  { %400 = vmatprep.subr.bf16.mxu1 %v475_v1  ;;  %414 = vmatprep.subr.bf16.mxu0 %v475_v1 }
  0x16   :  { %p458_p3 = por %p457_p2, %p456_p1 }
  0x18   :  { %401 = vmatpush3.bf16.msra.mxu1 %v440_v10  ;;  %415 = vmatpush3.bf16.msra.mxu0 %v445_v15  ;;  %p459_p4 = pnand %p458_p3, %p452_p0 }
  0x19   :  { %402 = vmatprep.subr.bf16.mxu1 %v475_v1  ;;  %416 = vmatprep.subr.bf16.mxu0 %v475_v1 }
  0x1c   :  { %403 = vmatpush3.bf16.msra.mxu1 %v441_v11  ;;  %417 = vmatpush3.bf16.msra.mxu0 %v446_v16 }
  0x1d   :  { %404 = vmatprep.subr.bf16.mxu1 %v475_v1  ;;  %418 = vmatprep.subr.bf16.mxu0 %v475_v1 }
  0x20   :  { %405 = vmatpush3.bf16.msra.mxu1 %v442_v12  ;;  %419 = vmatpush3.bf16.msra.mxu0 %v447_v17 }
  0x21   :  { %420 = vmatprep.subr.bf16.mxu0 %v475_v1 }
  0x24   :  { %421 = vmatpush3.bf16.msra.mxu0 %v448_v18 }
  0x25   :  { %422 = vmatprep.subr.bf16.mxu0 %v475_v1 }
  0x28   :  { %423 = vmatpush3.bf16.msra.mxu0 %v449_v27 }
  0x29   :  { %424 = vmatprep.subr.bf16.mxu0 %v475_v1 }
  0x2c   :  { %425 = vmatpush3.bf16.msra.mxu0 %v450_v28 }
  0xdc   :  { %v91_v20 = vpop.f32.mrb[0].mxu0 }
  0xdd   :  { %v92_v21 = vadd.f32 %v339_v19, %v91_v20  ;;  %v388_v22 = vpop.f32.mrb[1].mxu0 }
  0xde   :  { %v94_v23 = vpop.f32.mrb[2].mxu0 }
  0xdf   :  { %v97_v24 = vmax.f32 %v92_v21, 0.0  ;;  %v389_v25 = vpop.f32.mrb[3].mxu0 }
  0xe1   :  { %v98_v26 = vpack.c.bf16 %v97_v24, %v97_v24 }
  0xe3   :  { %407 = vmatmul.mubr.bf16.vlgmr.msra.gmra.mrb[0].mxu1 %v98_v26 }
 0x1b6   :  { %v204_v30 = vpop.f32.mrb[0].mxu1 }
 0x1b7   :  { %v205_v31 = vadd.f32 %v343_v29, %v204_v30  ;;  %v408_v32 = vpop.f32.mrb[1].mxu1 }
 0x1b8   :  { %v207_v33 = vpop.f32.mrb[2].mxu1 }
 0x1b9   :  { %v210_v34 = vmax.f32 %v205_v31, 0.0  ;;  %v409_v35 = vpop.f32.mrb[3].mxu1 }
 0x1bb   :  { %v211_v36 = vpack.c.bf16 %v210_v34, %v210_v34 }
 0x1bd   :  { %427 = vmatmul.mubr.bf16.vlgmr.msra.gmra.mrb[4].mxu0 %v211_v36 }
 0x290   :  { %v317_v38 = vpop.f32.mrb[4].mxu0 }
 0x291   :  { %v318_v39 = vadd.f32 %v352_v37, %v317_v38  ;;  %v428_v40 = vpop.f32.mrb[5].mxu0 }
 0x292   :  { %v320_v41 = vpop.f32.mrb[6].mxu0 }
 0x293   :  { %v429_v42 = vpop.f32.mrb[7].mxu0  ;;  %324 = vst.msk [vmem:[#allocation2] sm:$0xff] %vm323_vm2, %v318_v39 }
 0x294   :  { %462 = shalt.err (!%p459_p4)
}
 0x295   :  { %s463_s6 = scalar_lea.hbm %s627_s7, 128 }
 0x296   :  { %p464_p5 = scmp.ne.s32.totalorder %s627_s7, %s463_s6  ;;  %p467_p6 = scmp.lt.u32.totalorder %s463_s6, %s627_s7 }
 0x298   :  { %p469_p7 = pnand %p467_p6, %p464_p5 }
 0x29a   :  { %472 = shalt.err (!%p469_p7)
}
 0x29b   :  { %334 = dma.vmem_to_hbm [thread:$0]  %s332_s17, 128, %s627_s7, [#allocation3]  }
 0x29c   :  { %473 = dma.done.wait [#allocation3], 128  }
 0x29d   :  { %474 = vsyncadd [#allocation3], 4294967168 }
 0x29e   :  { %338 = vsyncpa [#allocation3], 1 }

</bundles_post_ra>
